<compile_context>
chip_gen: v6e
topology: v6e:2x2x1
jax: 0.10.0
libtpu: 0.0.40
codegen_flags: <defaults>
</compile_context>

<pallas_src>
import jax
import jax.numpy as jnp
from jax.experimental import pallas as pl
from jax.experimental.pallas import tpu as pltpu


_TILE_ROWS = 512                  # row tile for the gridded (large-input) path
_SINGLE_TILE_MAX_ROWS = 1024      # <= this many rows -> one full-extent tile
_VMEM_LIMIT_BYTES = 32 * 1024 * 1024


def _reduce_kernel(x_ref, min_ref, sum_ref, min_sc, sum_sc):
    """Fused single-pass global min(x) and sum(x), accumulated across tiles."""
    i = pl.program_id(0)

    @pl.when(i == 0)
    def _init():
        min_sc[...] = jnp.full_like(min_sc, jnp.inf)
        sum_sc[...] = jnp.zeros_like(sum_sc)

    x = x_ref[...]
    min_sc[...] = jnp.minimum(min_sc[...], jnp.min(x, keepdims=True))
    sum_sc[...] = sum_sc[...] + jnp.sum(x, keepdims=True)

    @pl.when(i == pl.num_programs(0) - 1)
    def _finalize():
        min_ref[...] = min_sc[...]
        sum_ref[...] = sum_sc[...]


def _scale_kernel(scale_ref, x_ref, o_ref):
    """out = x * inv_s + c  (scalars read from SMEM)."""
    inv_s = scale_ref[0]
    c = scale_ref[1]
    o_ref[...] = (x_ref[...] * inv_s + c).astype(o_ref.dtype)


def my_softmax(x):
    """Pallas implementation of MySoftMax.forward."""
    orig_shape = x.shape
    orig_dtype = x.dtype
    total = x.size

    # ---- choose a lane-dense layout --------------------------------------
    lanes = 128
    for cand in (1024, 512, 256, 128):
        if total >= 8 * cand:
            lanes = cand
            break

    rows = -(-total // lanes)
    if rows <= _SINGLE_TILE_MAX_ROWS:
        rows = -(-rows // 8) * 8          # keep sublane count a multiple of 8
        tile_rows = rows
    else:
        rows = -(-rows // _TILE_ROWS) * _TILE_ROWS
        tile_rows = _TILE_ROWS
    padded_total = rows * lanes
    npad = padded_total - total
    grid_n = rows // tile_rows

    xf = x.reshape(-1).astype(jnp.float32)   # keep all intermediates in f32
    last_val = None
    if npad:
        last_val = xf[-1]
        # Edge padding repeats the last element: min() is unaffected and the
        # sum is corrected below by npad * last_val.
        xf = jnp.pad(xf, (0, npad), mode="edge")
    x2d = xf.reshape(rows, lanes)

    # ---- phase 1: fused global min(x) / sum(x) ----------------------------
    min_out, sum_out = pl.pallas_call(
        _reduce_kernel,
        out_shape=(jax.ShapeDtypeStruct((1, 1), jnp.float32),
                   jax.ShapeDtypeStruct((1, 1), jnp.float32)),
        grid_spec=pltpu.PrefetchScalarGridSpec(
            num_scalar_prefetch=0,
            grid=(grid_n,),
            in_specs=[pl.BlockSpec((tile_rows, lanes), lambda i: (i, 0))],
            out_specs=(pl.BlockSpec((1, 1), lambda i: (0, 0)),
                       pl.BlockSpec((1, 1), lambda i: (0, 0))),
            scratch_shapes=[pltpu.VMEM((1, 1), jnp.float32),
                            pltpu.VMEM((1, 1), jnp.float32)]),
        compiler_params=pltpu.CompilerParams(
            dimension_semantics=("arbitrary",),
            vmem_limit_bytes=_VMEM_LIMIT_BYTES),
    )(x2d)

    # ---- scalar epilogue math (negligible, plain JAX) ----------------------
    mn = min_out[0, 0]
    sum_x = sum_out[0, 0]
    if npad:
        sum_x = sum_x - jnp.float32(npad) * last_val
    shift = jnp.float32(0.01) - mn                   # 0.01 - min(x)
    s = sum_x + jnp.float32(total) * shift           # == sum(y)
    inv_s = jnp.float32(1.0) / s                     # exact reciprocal (scalar)
    c = shift * inv_s
    scale = jnp.stack([inv_s, c]).astype(jnp.float32)   # (2,) scalars -> SMEM

    # ---- phase 2: tiled elementwise  out = x * inv_s + c -------------------
    out2d = pl.pallas_call(
        _scale_kernel,
        out_shape=jax.ShapeDtypeStruct((rows, lanes), orig_dtype),
        grid_spec=pltpu.PrefetchScalarGridSpec(
            num_scalar_prefetch=0,
            grid=(grid_n,),
            in_specs=[pl.BlockSpec(memory_space=pltpu.MemorySpace.SMEM),
                      pl.BlockSpec((tile_rows, lanes), lambda i: (i, 0))],
            out_specs=pl.BlockSpec((tile_rows, lanes), lambda i: (i, 0))),
        compiler_params=pltpu.CompilerParams(
            dimension_semantics=("parallel",),
            vmem_limit_bytes=_VMEM_LIMIT_BYTES),
    )(scale, x2d)

    out = out2d.reshape(-1)
    if npad:
        out = out[:total]
    return out.reshape(orig_shape)


def _reference(x):
    y = x - jnp.min(x) + 0.01
    return y / jnp.sum(y)


if __name__ == "__main__":
    key = jax.random.PRNGKey(0)
    x = jax.random.normal(key, (2, 4, 16, 16), dtype=jnp.float32)

    out = my_softmax(x)
    jax.block_until_ready(out)

    ref = _reference(x)
    assert out.shape == x.shape
    assert jnp.allclose(out, ref, atol=1e-6, rtol=1e-5), "mismatch vs reference"

    print("KERNEL_OK")
</pallas_src>

<mosaic_0001>
module attributes {stable_mosaic.version = 11 : i64} {
  func.func @_reduce_kernel(%arg0: i32, %arg1: memref<8x256xf32, #tpu.memory_space<vmem>>, %arg2: memref<1x1xf32, #tpu.memory_space<vmem>>, %arg3: memref<1x1xf32, #tpu.memory_space<vmem>>, %arg4: memref<1x1xf32, #tpu.memory_space<vmem>>, %arg5: memref<1x1xf32, #tpu.memory_space<vmem>>) attributes {dimension_semantics = [#tpu.dimension_semantics<arbitrary>], iteration_bounds = array<i64: 1>, scalar_prefetch = 0 : i64, scratch_operands = 2 : i64, tpu.core_type = #tpu.core_type<tc>, window_params = [{transform_indices = @transform_0, window_bounds = array<i64: 8, 256>}, {pipeline_mode = #tpu.pipeline_mode<synchronous>, transform_indices = @transform_1, window_bounds = array<i64: 1, 1>}, {pipeline_mode = #tpu.pipeline_mode<synchronous>, transform_indices = @transform_2, window_bounds = array<i64: 1, 1>}]} {
    %c0_i32 = arith.constant 0 : i32
    %0 = arith.cmpi eq, %arg0, %c0_i32 : i32
    %1 = arith.extui %0 : i1 to i32
    %c0_i32_0 = arith.constant 0 : i32
    %2 = arith.cmpi ne, %1, %c0_i32_0 : i32
    scf.if %2 {
      %cst_13 = arith.constant 0x7F800000 : f32
      %23 = vector.broadcast %cst_13 : f32 to vector<1x1xf32>
      %c0_14 = arith.constant 0 : index
      %c0_15 = arith.constant 0 : index
      %24 = vector.load %arg4[%c0_14, %c0_15] : memref<1x1xf32, #tpu.memory_space<vmem>>, vector<1x1xf32>
      tpu.vector_store %arg4[%c0_14, %c0_15], %23 {strides = array<i32>} : memref<1x1xf32, #tpu.memory_space<vmem>>, vector<1x1xf32>,
      %cst_16 = arith.constant 0.000000e+00 : f32
      %25 = vector.broadcast %cst_16 : f32 to vector<1x1xf32>
      %c0_17 = arith.constant 0 : index
      %c0_18 = arith.constant 0 : index
      %26 = vector.load %arg5[%c0_17, %c0_18] : memref<1x1xf32, #tpu.memory_space<vmem>>, vector<1x1xf32>
      tpu.vector_store %arg5[%c0_17, %c0_18], %25 {strides = array<i32>} : memref<1x1xf32, #tpu.memory_space<vmem>>, vector<1x1xf32>,
    } else {
    }
    %c0 = arith.constant 0 : index
    %c0_1 = arith.constant 0 : index
    %3 = vector.load %arg1[%c0, %c0_1] : memref<8x256xf32, #tpu.memory_space<vmem>>, vector<8x256xf32>
    %c0_2 = arith.constant 0 : index
    %c0_3 = arith.constant 0 : index
    %4 = vector.load %arg4[%c0_2, %c0_3] : memref<1x1xf32, #tpu.memory_space<vmem>>, vector<1x1xf32>
    %5 = vector.shape_cast %3 : vector<8x256xf32> to vector<1x8x256xf32>
    %cst = arith.constant dense<0x7F800000> : vector<1xf32>
    %6 = vector.multi_reduction <minimumf>, %5, %cst [1, 2] : vector<1x8x256xf32> to vector<1xf32>
    %7 = vector.shape_cast %6 : vector<1xf32> to vector<1x1x1xf32>
    %8 = vector.extract %7[0, 0, 0] : f32 from vector<1x1x1xf32>
    %9 = vector.broadcast %8 : f32 to vector<1x1xf32>
    %10 = arith.minimumf %4, %9 : vector<1x1xf32>
    %c0_4 = arith.constant 0 : index
    %c0_5 = arith.constant 0 : index
    %11 = vector.load %arg4[%c0_4, %c0_5] : memref<1x1xf32, #tpu.memory_space<vmem>>, vector<1x1xf32>
    tpu.vector_store %arg4[%c0_4, %c0_5], %10 {strides = array<i32>} : memref<1x1xf32, #tpu.memory_space<vmem>>, vector<1x1xf32>,
    %c0_6 = arith.constant 0 : index
    %c0_7 = arith.constant 0 : index
    %12 = vector.load %arg5[%c0_6, %c0_7] : memref<1x1xf32, #tpu.memory_space<vmem>>, vector<1x1xf32>
    %13 = vector.shape_cast %3 : vector<8x256xf32> to vector<1x8x256xf32>
    %cst_8 = arith.constant dense<0.000000e+00> : vector<1xf32>
    %14 = vector.multi_reduction <add>, %13, %cst_8 [1, 2] : vector<1x8x256xf32> to vector<1xf32>
    %15 = vector.shape_cast %14 : vector<1xf32> to vector<1x1x1xf32>
    %16 = vector.extract %15[0, 0, 0] : f32 from vector<1x1x1xf32>
    %17 = vector.broadcast %16 : f32 to vector<1x1xf32>
    %18 = arith.addf %12, %17 : vector<1x1xf32>
    %c0_9 = arith.constant 0 : index
    %c0_10 = arith.constant 0 : index
    %19 = vector.load %arg5[%c0_9, %c0_10] : memref<1x1xf32, #tpu.memory_space<vmem>>, vector<1x1xf32>
    tpu.vector_store %arg5[%c0_9, %c0_10], %18 {strides = array<i32>} : memref<1x1xf32, #tpu.memory_space<vmem>>, vector<1x1xf32>,
    %c0_i32_11 = arith.constant 0 : i32
    %20 = arith.cmpi eq, %arg0, %c0_i32_11 : i32
    %21 = arith.extui %20 : i1 to i32
    %c0_i32_12 = arith.constant 0 : i32
    %22 = arith.cmpi ne, %21, %c0_i32_12 : i32
    scf.if %22 {
      %c0_13 = arith.constant 0 : index
      %c0_14 = arith.constant 0 : index
      %23 = vector.load %arg4[%c0_13, %c0_14] : memref<1x1xf32, #tpu.memory_space<vmem>>, vector<1x1xf32>
      %c0_15 = arith.constant 0 : index
      %c0_16 = arith.constant 0 : index
      %24 = vector.load %arg2[%c0_15, %c0_16] : memref<1x1xf32, #tpu.memory_space<vmem>>, vector<1x1xf32>
      tpu.vector_store %arg2[%c0_15, %c0_16], %23 {strides = array<i32>} : memref<1x1xf32, #tpu.memory_space<vmem>>, vector<1x1xf32>,
      %c0_17 = arith.constant 0 : index
      %c0_18 = arith.constant 0 : index
      %25 = vector.load %arg5[%c0_17, %c0_18] : memref<1x1xf32, #tpu.memory_space<vmem>>, vector<1x1xf32>
      %c0_19 = arith.constant 0 : index
      %c0_20 = arith.constant 0 : index
      %26 = vector.load %arg3[%c0_19, %c0_20] : memref<1x1xf32, #tpu.memory_space<vmem>>, vector<1x1xf32>
      tpu.vector_store %arg3[%c0_19, %c0_20], %25 {strides = array<i32>} : memref<1x1xf32, #tpu.memory_space<vmem>>, vector<1x1xf32>,
    } else {
    }
    return
  }
  func.func @transform_0(%arg0: i32) -> (i32, i32) {
    %c0_i32 = arith.constant 0 : i32
    %c0_i32_0 = arith.constant 0 : i32
    return %arg0, %c0_i32 : i32, i32
  }
  func.func @transform_1(%arg0: i32) -> (i32, i32) {
    %c0_i32 = arith.constant 0 : i32
    %c0_i32_0 = arith.constant 0 : i32
    %c0_i32_1 = arith.constant 0 : i32
    return %c0_i32, %c0_i32_0 : i32, i32
  }
  func.func @transform_2(%arg0: i32) -> (i32, i32) {
    %c0_i32 = arith.constant 0 : i32
    %c0_i32_0 = arith.constant 0 : i32
    %c0_i32_1 = arith.constant 0 : i32
    return %c0_i32, %c0_i32_0 : i32, i32
  }
}

</mosaic_0001>

<bundles_post_ra>
// kernel: tpu_custom_call.1
= control target key start
LH: loop header
LB: loop body
LE: loop exit
PB: predicated region body
PF: predicated region fallthrough
CT: control target
= control target key end

     0   :  { %8 = vsyncpa [#allocation5], 0  ;;  %s208_s0 = inlined_call_operand.hbm [shape: f32[8,256], index: 0, kind: input, shape index: {}]   ;;  %s209_s1 = inlined_call_operand.hbm [shape: f32[1,1], index: 1, kind: output, shape index: {0}]   ;;  %s210_s2 = inlined_call_operand.hbm [shape: f32[1,1], index: 2, kind: output, shape index: {1}]  }
   0x1   :  { %9 = vsyncpa [#allocation6], 0 }
   0x2   :  { %10 = vsyncpa [#allocation9], 0  ;;  %s173_s9 = smov [#allocation4]  }
   0x3   :  { %s17_s10 = sshll.u32 %s173_s9, 4  ;;  %s18_s10 = int_to_ptr.vmem [resolvable:$true] %s17_s10 }
   0x4   :  { %s115_s11 = scalar_lea.vmem %s18_s10, 256  ;;  %p120_p1 = scmp.lt.s32.totalorder %s18_s10, %s18_s10 }
   0x5   :  { %p116_p0 = scmp.ne.s32.totalorder %s18_s10, %s115_s11  ;;  %p121_p2 = scmp.lt.s32.totalorder %s115_s11, %s115_s11 }
   0x7   :  { %p122_p3 = por %p121_p2, %p120_p1 }
   0x9   :  { %p123_p4 = pnand %p122_p3, %p116_p0 }
   0xb   :  { %126 = shalt.err (!%p123_p4)
}
   0xc   :  { %20 = dma.hbm_to_vmem [thread:$0]  %s208_s0, 256, %s18_s10, [#allocation5]  }
   0xd   :  { %167 = dma.done.wait [#allocation5], 256  }
   0xe   :  { %168 = vsyncadd [#allocation5], 4294967040  ;;  %v31_v0 = vld [vmem:[#allocation4] sm:$0xff]  ;;  %v32_v1 = vld [vmem:[#allocation4 + $0x8] sm:$0xff]  ;;  %vm28_vm0 = vcmask 0   ;;  %v174_v4 = vmov inf  }
   0xf   :  { %v34_v2 = vmin.f32 %v31_v0, %v32_v1  ;;  %v49_v3 = vadd.f32 %v32_v1, %v31_v0  ;;  %29 = vst.msk [vmem:[#allocation2] sm:$0x1] %vm28_vm0, %v174_v4  ;;  %v175_v5 = vmov 0.0   ;;  %s176_s15 = smov [#allocation7]   ;;  %s177_s17 = smov [#allocation8]  }
  0x10   :  { %30 = vst.msk [vmem:[#allocation3] sm:$0x1] %vm28_vm0, %v175_v5  ;;  %s75_s16 = sshll.u32 %s176_s15, 4  ;;  %s85_s18 = sshll.u32 %s177_s17, 4  ;;  %s76_s16 = int_to_ptr.vmem [resolvable:$true] %s75_s16  ;;  %s86_s18 = int_to_ptr.vmem [resolvable:$true] %s85_s18 }
  0x11   :  { %35 = vmin.xlane.f32.xlu0 %v34_v2  ;;  %s127_s19 = scalar_lea.vmem %s76_s16, 16  ;;  %s131_s20 = scalar_lea.vmem %s76_s16, 32 }
  0x12   :  { %p128_p5 = scmp.ne.s32.totalorder %s76_s16, %s127_s19  ;;  %p132_p6 = scmp.lt.s32.totalorder %s76_s16, %s76_s16 }
  0x13   :  { %p133_p7 = scmp.lt.s32.totalorder %s131_s20, %s127_s19 }
  0x15   :  { %50 = vadd.xlane.f32.xlu0 %v49_v3  ;;  %p134_p8 = por %p133_p7, %p132_p6 }
  0x16   :  { %v33_v20 = vld [vmem:[#allocation2] sm:$0x1] }
  0x17   :  { %v48_v23 = vld [vmem:[#allocation3] sm:$0x1]  ;;  %p135_p9 = pnand %p134_p8, %p128_p5 }
  0x9a   :  { %v36_v6 = vpop.xlane.xlu0 %35 }
  0x9b   :  { %v37_v7 = vrot.slane %v36_v6, 4 }
  0x9d   :  { %v38_v8 = vmin.f32 %v36_v6, %v37_v7 }
  0x9e   :  { %v51_v9 = vpop.xlane.xlu0 %50 }
  0x9f   :  { %v39_v10 = vrot.slane %v38_v8, 2  ;;  %v52_v11 = vrot.slane %v51_v9, 4 }
  0xa1   :  { %v53_v12 = vadd.f32 %v52_v11, %v51_v9  ;;  %v40_v13 = vmin.f32 %v38_v8, %v39_v10 }
  0xa3   :  { %v54_v14 = vrot.slane %v53_v12, 2  ;;  %v41_v15 = vrot.slane %v40_v13, 1 }
  0xa5   :  { %v55_v16 = vadd.f32 %v54_v14, %v53_v12  ;;  %v42_v17 = vmin.f32 %v40_v13, %v41_v15 }
  0xa7   :  { %98 = vpush %v42_v17  ;;  %v56_v18 = vrot.slane %v55_v16, 1 }
  0xa9   :  { %v57_v19 = vadd.f32 %v56_v18, %v55_v16 }
  0xab   :  { %100 = vpush %v57_v19 }
  0xd8   :  { %s99_s0 = spop %98 }
  0xd9   :  { %v44_v21 = vstv %s99_s0 }
  0xda   :  { %v45_v22 = vmin.f32 %v33_v20, %v44_v21 }
  0xdc   :  { %47 = vst.msk [vmem:[#allocation2] sm:$0x1] %vm28_vm0, %v45_v22  ;;  %s101_s14 = spop %100 }
  0xdd   :  { %v59_v24 = vstv %s101_s14 }
  0xde   :  { %v60_v25 = vadd.f32 %v59_v24, %v48_v23 }
  0xe0   :  { %61 = vst.msk [vmem:[#allocation3] sm:$0x1] %vm28_vm0, %v60_v25 }
  0xe3   :  { %v65_v26 = vld [vmem:[#allocation2] sm:$0x1] }
  0xe4   :  { %66 = vst.msk [vmem:[#allocation7] sm:$0x1] %vm28_vm0, %v65_v26 }
  0xe5   :  { %138 = shalt.err (!%p135_p9)
}
  0xe6   :  { %78 = dma.vmem_to_hbm [thread:$0]  %s76_s16, 16, %s209_s1, [#allocation6]  }
  0xe7   :  { %v67_v27 = vld [vmem:[#allocation3] sm:$0x1]  ;;  %s147_s23 = scalar_lea.vmem %s86_s18, 16  ;;  %s151_s24 = scalar_lea.vmem %s86_s18, 32 }
  0xe8   :  { %68 = vst.msk [vmem:[#allocation8] sm:$0x1] %vm28_vm0, %v67_v27  ;;  %p148_p10 = scmp.ne.s32.totalorder %s86_s18, %s147_s23  ;;  %p152_p11 = scmp.lt.s32.totalorder %s86_s18, %s86_s18 }
  0xe9   :  { %p153_p12 = scmp.lt.s32.totalorder %s151_s24, %s147_s23 }
  0xeb   :  { %p154_p13 = por %p153_p12, %p152_p11 }
  0xed   :  { %p155_p0 = pnand %p154_p13, %p148_p10 }
  0xef   :  { %158 = shalt.err (!%p155_p0)
}
  0xf0   :  { %88 = dma.vmem_to_hbm [thread:$0]  %s86_s18, 16, %s210_s2, [#allocation9]  }
  0xf1   :  { %169 = dma.done.wait [#allocation6], 16  }
  0xf2   :  { %170 = vsyncadd [#allocation6], 4294967280 }
  0xf3   :  { %171 = dma.done.wait [#allocation9], 16  }
  0xf4   :  { %172 = vsyncadd [#allocation9], 4294967280 }
  0xf5   :  { %95 = vsyncpa [#allocation5], 1 }
  0xf6   :  { %96 = vsyncpa [#allocation6], 1 }
  0xf7   :  { %97 = vsyncpa [#allocation9], 1 }

</bundles_post_ra>
